<compile_context>
chip_gen: v7x
topology: tpu7x:2x2x1
jax: 0.10.0
libtpu: 0.0.40
codegen_flags: <defaults>
</compile_context>

<pallas_src>
import functools

import jax
import jax.numpy as jnp
from jax.experimental import pallas as pl
from jax.experimental.pallas import tpu as pltpu

IN_DIM = 3
H1_DIM = 4
H2_DIM = 4
OUT_DIM = 1

# Packed-parameter layout (flat f32 vector living in SMEM).
W1_OFF = 0                               # (IN_DIM, H1_DIM) row-major
B1_OFF = W1_OFF + IN_DIM * H1_DIM        # (H1_DIM,)
W2_OFF = B1_OFF + H1_DIM                 # (H1_DIM, H2_DIM) row-major
B2_OFF = W2_OFF + H1_DIM * H2_DIM        # (H2_DIM,)
W3_OFF = B2_OFF + H2_DIM                 # (H2_DIM, OUT_DIM) row-major
B3_OFF = W3_OFF + H2_DIM * OUT_DIM       # (OUT_DIM,)
N_PARAMS = B3_OFF + OUT_DIM              # = 41


def mlp_kernel(p_ref, x_ref, o_ref):
    """Fused feature-major MLP.

    p_ref: (N_PARAMS,) f32 in SMEM  -- all weights/biases as scalars
    x_ref: (IN_DIM, bt) f32 in VMEM -- batch on the lane axis (lane-dense)
    o_ref: (1, bt)      f32 in VMEM -- lane-dense output

    Pure VPU broadcast-multiply-add work (fully unrolled); no MXU, no XLU.
    """
    x = x_ref[...]                                        # (IN_DIM, bt)
    xr = [x[k:k + 1, :] for k in range(IN_DIM)]           # IN_DIM x (1, bt)

    # Layer 1: h1_j = relu(sum_k w1[k, j] * x_k + b1[j])
    h1 = []
    for j in range(H1_DIM):
        s = xr[0] * p_ref[W1_OFF + 0 * H1_DIM + j]
        for k in range(1, IN_DIM):
            s = s + xr[k] * p_ref[W1_OFF + k * H1_DIM + j]
        h1.append(jnp.maximum(s + p_ref[B1_OFF + j], 0.0))

    # Layer 2: h2_j = relu(sum_k w2[k, j] * h1_k + b2[j])
    h2 = []
    for j in range(H2_DIM):
        s = h1[0] * p_ref[W2_OFF + 0 * H2_DIM + j]
        for k in range(1, H1_DIM):
            s = s + h1[k] * p_ref[W2_OFF + k * H2_DIM + j]
        h2.append(jnp.maximum(s + p_ref[B2_OFF + j], 0.0))

    # Layer 3 (single output unit): o = sum_k w3[k, 0] * h2_k + b3[0]
    o = h2[0] * p_ref[W3_OFF + 0]
    for k in range(1, H2_DIM):
        o = o + h2[k] * p_ref[W3_OFF + k]
    o_ref[...] = (o + p_ref[B3_OFF]).astype(o_ref.dtype)


def _round_up(n, m):
    return ((n + m - 1) // m) * m


def pack_params(params):
    """Flatten (w1, b1, w2, b2, w3, b3) into the SMEM scalar vector."""
    w1, b1, w2, b2, w3, b3 = params
    flat = jnp.concatenate([
        w1.reshape(-1), b1.reshape(-1),
        w2.reshape(-1), b2.reshape(-1),
        w3.reshape(-1), b3.reshape(-1),
    ]).astype(jnp.float32)
    assert flat.shape[0] == N_PARAMS
    return flat


def mlp_forward(x, params, *, batch_tile=1024):
    """x: (B, 3) float32. Returns torch.squeeze-equivalent output ((B,) for B>1)."""
    B = x.shape[0]
    # Lane-dense tile: multiple of 128, capped at batch_tile, >= 2 grid steps
    # whenever B is large enough (helps v7x's 2 TensorCores via 'parallel').
    bt = min(batch_tile, _round_up(B, 128))
    padded_B = _round_up(B, bt)
    grid_n = padded_B // bt

    packed = pack_params(params)

    # Feature-major layout: (3, padded_B), batch on the lane axis; padded rows
    # compute garbage and are sliced off below.
    x_fm = jnp.pad(x.astype(jnp.float32).T, ((0, 0), (0, padded_B - B)))

    flops = 2 * B * (IN_DIM * H1_DIM + H1_DIM * H2_DIM + H2_DIM * OUT_DIM)
    bytes_accessed = B * 4 * (IN_DIM + OUT_DIM) + 4 * N_PARAMS

    out = pl.pallas_call(
        mlp_kernel,
        out_shape=jax.ShapeDtypeStruct((1, padded_B), jnp.float32),
        grid=(grid_n,),
        in_specs=[
            # All 41 weight/bias scalars: one tiny SMEM-resident vector.
            pl.BlockSpec(memory_space=pltpu.MemorySpace.SMEM),
            # Lane-dense x tile, streamed/double-buffered over the batch.
            pl.BlockSpec((IN_DIM, bt), lambda i: (0, i)),
        ],
        out_specs=pl.BlockSpec((1, bt), lambda i: (0, i)),
        compiler_params=pltpu.CompilerParams(
            dimension_semantics=("parallel",),
        ),
        cost_estimate=pl.CostEstimate(
            flops=flops, transcendentals=0, bytes_accessed=bytes_accessed),
    )(packed, x_fm)

    # torch.squeeze on the (B, 1) result: (B,) for B > 1, () for B == 1.
    return jnp.squeeze(out[0, :B])


def init_params(key):
    """Deterministic params matching nn.Linear shapes, stored pre-transposed
    as (in, out); biases 1-D."""
    k1, k2, k3, k4, k5, k6 = jax.random.split(key, 6)

    def uniform(k, shape, fan_in):
        bound = 1.0 / jnp.sqrt(fan_in)
        return jax.random.uniform(k, shape, jnp.float32, -bound, bound)

    w1 = uniform(k1, (IN_DIM, H1_DIM), IN_DIM)
    b1 = uniform(k2, (H1_DIM,), IN_DIM)
    w2 = uniform(k3, (H1_DIM, H2_DIM), H1_DIM)
    b2 = uniform(k4, (H2_DIM,), H1_DIM)
    w3 = uniform(k5, (H2_DIM, OUT_DIM), H2_DIM)
    b3 = uniform(k6, (OUT_DIM,), H2_DIM)
    return (w1, b1, w2, b2, w3, b3)


if __name__ == "__main__":
    key = jax.random.PRNGKey(0)
    kx, kp = jax.random.split(key)

    B = 8  # small batch consistent with the module (in_features=3)
    x = jax.random.normal(kx, (B, IN_DIM), dtype=jnp.float32)
    params = init_params(kp)

    fwd = jax.jit(functools.partial(mlp_forward, batch_tile=1024))
    y = fwd(x, params)
    y = jax.block_until_ready(y)

    # Pure-JAX reference (same math, no Pallas)
    w1, b1, w2, b2, w3, b3 = params
    ref = jnp.maximum(x @ w1 + b1, 0.0)
    ref = jnp.maximum(ref @ w2 + b2, 0.0)
    ref = jnp.squeeze(ref @ w3 + b3)

    assert y.shape == (B,)
    assert jnp.allclose(y, ref, atol=1e-5, rtol=1e-5)

    print("KERNEL_OK")
</pallas_src>

<mosaic_0001>
module attributes {stable_mosaic.version = 11 : i64} {
  func.func @mlp_kernel(%arg0: i32, %arg1: memref<41xf32, #tpu.memory_space<smem>>, %arg2: memref<3x128xf32, #tpu.memory_space<vmem>>, %arg3: memref<1x128xf32, #tpu.memory_space<vmem>>) attributes {dimension_semantics = [#tpu.dimension_semantics<parallel>], iteration_bounds = array<i64: 1>, scalar_prefetch = 0 : i64, scratch_operands = 0 : i64, tpu.core_type = #tpu.core_type<tc>, window_params = [{transform_indices = @transform_0, window_bounds = array<i64: 41>}, {transform_indices = @transform_1, window_bounds = array<i64: 3, 128>}, {transform_indices = @transform_2, window_bounds = array<i64: 1, 128>}]} {
    %c0 = arith.constant 0 : index
    %c0_0 = arith.constant 0 : index
    %0 = vector.load %arg2[%c0, %c0_0] : memref<3x128xf32, #tpu.memory_space<vmem>>, vector<3x128xf32>
    %1 = vector.extract_strided_slice %0 {offsets = [0, 0], sizes = [1, 128], strides = [1, 1]} : vector<3x128xf32> to vector<1x128xf32>
    %2 = vector.extract_strided_slice %0 {offsets = [1, 0], sizes = [1, 128], strides = [1, 1]} : vector<3x128xf32> to vector<1x128xf32>
    %3 = vector.extract_strided_slice %0 {offsets = [2, 0], sizes = [1, 128], strides = [1, 1]} : vector<3x128xf32> to vector<1x128xf32>
    %c0_1 = arith.constant 0 : index
    %4 = memref.load %arg1[%c0_1] : memref<41xf32, #tpu.memory_space<smem>>
    %5 = vector.broadcast %4 : f32 to vector<1x128xf32>
    %6 = arith.mulf %1, %5 : vector<1x128xf32>
    %c4 = arith.constant 4 : index
    %7 = memref.load %arg1[%c4] : memref<41xf32, #tpu.memory_space<smem>>
    %8 = vector.broadcast %7 : f32 to vector<1x128xf32>
    %9 = arith.mulf %2, %8 : vector<1x128xf32>
    %10 = arith.addf %6, %9 : vector<1x128xf32>
    %c8 = arith.constant 8 : index
    %11 = memref.load %arg1[%c8] : memref<41xf32, #tpu.memory_space<smem>>
    %12 = vector.broadcast %11 : f32 to vector<1x128xf32>
    %13 = arith.mulf %3, %12 : vector<1x128xf32>
    %14 = arith.addf %10, %13 : vector<1x128xf32>
    %c12 = arith.constant 12 : index
    %15 = memref.load %arg1[%c12] : memref<41xf32, #tpu.memory_space<smem>>
    %16 = vector.broadcast %15 : f32 to vector<1x128xf32>
    %17 = arith.addf %14, %16 : vector<1x128xf32>
    %cst = arith.constant 0.000000e+00 : f32
    %18 = vector.broadcast %cst : f32 to vector<1x128xf32>
    %19 = arith.maximumf %17, %18 : vector<1x128xf32>
    %c1 = arith.constant 1 : index
    %20 = memref.load %arg1[%c1] : memref<41xf32, #tpu.memory_space<smem>>
    %21 = vector.broadcast %20 : f32 to vector<1x128xf32>
    %22 = arith.mulf %1, %21 : vector<1x128xf32>
    %c5 = arith.constant 5 : index
    %23 = memref.load %arg1[%c5] : memref<41xf32, #tpu.memory_space<smem>>
    %24 = vector.broadcast %23 : f32 to vector<1x128xf32>
    %25 = arith.mulf %2, %24 : vector<1x128xf32>
    %26 = arith.addf %22, %25 : vector<1x128xf32>
    %c9 = arith.constant 9 : index
    %27 = memref.load %arg1[%c9] : memref<41xf32, #tpu.memory_space<smem>>
    %28 = vector.broadcast %27 : f32 to vector<1x128xf32>
    %29 = arith.mulf %3, %28 : vector<1x128xf32>
    %30 = arith.addf %26, %29 : vector<1x128xf32>
    %c13 = arith.constant 13 : index
    %31 = memref.load %arg1[%c13] : memref<41xf32, #tpu.memory_space<smem>>
    %32 = vector.broadcast %31 : f32 to vector<1x128xf32>
    %33 = arith.addf %30, %32 : vector<1x128xf32>
    %cst_2 = arith.constant 0.000000e+00 : f32
    %34 = vector.broadcast %cst_2 : f32 to vector<1x128xf32>
    %35 = arith.maximumf %33, %34 : vector<1x128xf32>
    %c2 = arith.constant 2 : index
    %36 = memref.load %arg1[%c2] : memref<41xf32, #tpu.memory_space<smem>>
    %37 = vector.broadcast %36 : f32 to vector<1x128xf32>
    %38 = arith.mulf %1, %37 : vector<1x128xf32>
    %c6 = arith.constant 6 : index
    %39 = memref.load %arg1[%c6] : memref<41xf32, #tpu.memory_space<smem>>
    %40 = vector.broadcast %39 : f32 to vector<1x128xf32>
    %41 = arith.mulf %2, %40 : vector<1x128xf32>
    %42 = arith.addf %38, %41 : vector<1x128xf32>
    %c10 = arith.constant 10 : index
    %43 = memref.load %arg1[%c10] : memref<41xf32, #tpu.memory_space<smem>>
    %44 = vector.broadcast %43 : f32 to vector<1x128xf32>
    %45 = arith.mulf %3, %44 : vector<1x128xf32>
    %46 = arith.addf %42, %45 : vector<1x128xf32>
    %c14 = arith.constant 14 : index
    %47 = memref.load %arg1[%c14] : memref<41xf32, #tpu.memory_space<smem>>
    %48 = vector.broadcast %47 : f32 to vector<1x128xf32>
    %49 = arith.addf %46, %48 : vector<1x128xf32>
    %cst_3 = arith.constant 0.000000e+00 : f32
    %50 = vector.broadcast %cst_3 : f32 to vector<1x128xf32>
    %51 = arith.maximumf %49, %50 : vector<1x128xf32>
    %c3 = arith.constant 3 : index
    %52 = memref.load %arg1[%c3] : memref<41xf32, #tpu.memory_space<smem>>
    %53 = vector.broadcast %52 : f32 to vector<1x128xf32>
    %54 = arith.mulf %1, %53 : vector<1x128xf32>
    %c7 = arith.constant 7 : index
    %55 = memref.load %arg1[%c7] : memref<41xf32, #tpu.memory_space<smem>>
    %56 = vector.broadcast %55 : f32 to vector<1x128xf32>
    %57 = arith.mulf %2, %56 : vector<1x128xf32>
    %58 = arith.addf %54, %57 : vector<1x128xf32>
    %c11 = arith.constant 11 : index
    %59 = memref.load %arg1[%c11] : memref<41xf32, #tpu.memory_space<smem>>
    %60 = vector.broadcast %59 : f32 to vector<1x128xf32>
    %61 = arith.mulf %3, %60 : vector<1x128xf32>
    %62 = arith.addf %58, %61 : vector<1x128xf32>
    %c15 = arith.constant 15 : index
    %63 = memref.load %arg1[%c15] : memref<41xf32, #tpu.memory_space<smem>>
    %64 = vector.broadcast %63 : f32 to vector<1x128xf32>
    %65 = arith.addf %62, %64 : vector<1x128xf32>
    %cst_4 = arith.constant 0.000000e+00 : f32
    %66 = vector.broadcast %cst_4 : f32 to vector<1x128xf32>
    %67 = arith.maximumf %65, %66 : vector<1x128xf32>
    %c16 = arith.constant 16 : index
    %68 = memref.load %arg1[%c16] : memref<41xf32, #tpu.memory_space<smem>>
    %69 = vector.broadcast %68 : f32 to vector<1x128xf32>
    %70 = arith.mulf %19, %69 : vector<1x128xf32>
    %c20 = arith.constant 20 : index
    %71 = memref.load %arg1[%c20] : memref<41xf32, #tpu.memory_space<smem>>
    %72 = vector.broadcast %71 : f32 to vector<1x128xf32>
    %73 = arith.mulf %35, %72 : vector<1x128xf32>
    %74 = arith.addf %70, %73 : vector<1x128xf32>
    %c24 = arith.constant 24 : index
    %75 = memref.load %arg1[%c24] : memref<41xf32, #tpu.memory_space<smem>>
    %76 = vector.broadcast %75 : f32 to vector<1x128xf32>
    %77 = arith.mulf %51, %76 : vector<1x128xf32>
    %78 = arith.addf %74, %77 : vector<1x128xf32>
    %c28 = arith.constant 28 : index
    %79 = memref.load %arg1[%c28] : memref<41xf32, #tpu.memory_space<smem>>
    %80 = vector.broadcast %79 : f32 to vector<1x128xf32>
    %81 = arith.mulf %67, %80 : vector<1x128xf32>
    %82 = arith.addf %78, %81 : vector<1x128xf32>
    %c32 = arith.constant 32 : index
    %83 = memref.load %arg1[%c32] : memref<41xf32, #tpu.memory_space<smem>>
    %84 = vector.broadcast %83 : f32 to vector<1x128xf32>
    %85 = arith.addf %82, %84 : vector<1x128xf32>
    %cst_5 = arith.constant 0.000000e+00 : f32
    %86 = vector.broadcast %cst_5 : f32 to vector<1x128xf32>
    %87 = arith.maximumf %85, %86 : vector<1x128xf32>
    %c17 = arith.constant 17 : index
    %88 = memref.load %arg1[%c17] : memref<41xf32, #tpu.memory_space<smem>>
    %89 = vector.broadcast %88 : f32 to vector<1x128xf32>
    %90 = arith.mulf %19, %89 : vector<1x128xf32>
    %c21 = arith.constant 21 : index
    %91 = memref.load %arg1[%c21] : memref<41xf32, #tpu.memory_space<smem>>
    %92 = vector.broadcast %91 : f32 to vector<1x128xf32>
    %93 = arith.mulf %35, %92 : vector<1x128xf32>
    %94 = arith.addf %90, %93 : vector<1x128xf32>
    %c25 = arith.constant 25 : index
    %95 = memref.load %arg1[%c25] : memref<41xf32, #tpu.memory_space<smem>>
    %96 = vector.broadcast %95 : f32 to vector<1x128xf32>
    %97 = arith.mulf %51, %96 : vector<1x128xf32>
    %98 = arith.addf %94, %97 : vector<1x128xf32>
    %c29 = arith.constant 29 : index
    %99 = memref.load %arg1[%c29] : memref<41xf32, #tpu.memory_space<smem>>
    %100 = vector.broadcast %99 : f32 to vector<1x128xf32>
    %101 = arith.mulf %67, %100 : vector<1x128xf32>
    %102 = arith.addf %98, %101 : vector<1x128xf32>
    %c33 = arith.constant 33 : index
    %103 = memref.load %arg1[%c33] : memref<41xf32, #tpu.memory_space<smem>>
    %104 = vector.broadcast %103 : f32 to vector<1x128xf32>
    %105 = arith.addf %102, %104 : vector<1x128xf32>
    %cst_6 = arith.constant 0.000000e+00 : f32
    %106 = vector.broadcast %cst_6 : f32 to vector<1x128xf32>
    %107 = arith.maximumf %105, %106 : vector<1x128xf32>
    %c18 = arith.constant 18 : index
    %108 = memref.load %arg1[%c18] : memref<41xf32, #tpu.memory_space<smem>>
    %109 = vector.broadcast %108 : f32 to vector<1x128xf32>
    %110 = arith.mulf %19, %109 : vector<1x128xf32>
    %c22 = arith.constant 22 : index
    %111 = memref.load %arg1[%c22] : memref<41xf32, #tpu.memory_space<smem>>
    %112 = vector.broadcast %111 : f32 to vector<1x128xf32>
    %113 = arith.mulf %35, %112 : vector<1x128xf32>
    %114 = arith.addf %110, %113 : vector<1x128xf32>
    %c26 = arith.constant 26 : index
    %115 = memref.load %arg1[%c26] : memref<41xf32, #tpu.memory_space<smem>>
    %116 = vector.broadcast %115 : f32 to vector<1x128xf32>
    %117 = arith.mulf %51, %116 : vector<1x128xf32>
    %118 = arith.addf %114, %117 : vector<1x128xf32>
    %c30 = arith.constant 30 : index
    %119 = memref.load %arg1[%c30] : memref<41xf32, #tpu.memory_space<smem>>
    %120 = vector.broadcast %119 : f32 to vector<1x128xf32>
    %121 = arith.mulf %67, %120 : vector<1x128xf32>
    %122 = arith.addf %118, %121 : vector<1x128xf32>
    %c34 = arith.constant 34 : index
    %123 = memref.load %arg1[%c34] : memref<41xf32, #tpu.memory_space<smem>>
    %124 = vector.broadcast %123 : f32 to vector<1x128xf32>
    %125 = arith.addf %122, %124 : vector<1x128xf32>
    %cst_7 = arith.constant 0.000000e+00 : f32
    %126 = vector.broadcast %cst_7 : f32 to vector<1x128xf32>
    %127 = arith.maximumf %125, %126 : vector<1x128xf32>
    %c19 = arith.constant 19 : index
    %128 = memref.load %arg1[%c19] : memref<41xf32, #tpu.memory_space<smem>>
    %129 = vector.broadcast %128 : f32 to vector<1x128xf32>
    %130 = arith.mulf %19, %129 : vector<1x128xf32>
    %c23 = arith.constant 23 : index
    %131 = memref.load %arg1[%c23] : memref<41xf32, #tpu.memory_space<smem>>
    %132 = vector.broadcast %131 : f32 to vector<1x128xf32>
    %133 = arith.mulf %35, %132 : vector<1x128xf32>
    %134 = arith.addf %130, %133 : vector<1x128xf32>
    %c27 = arith.constant 27 : index
    %135 = memref.load %arg1[%c27] : memref<41xf32, #tpu.memory_space<smem>>
    %136 = vector.broadcast %135 : f32 to vector<1x128xf32>
    %137 = arith.mulf %51, %136 : vector<1x128xf32>
    %138 = arith.addf %134, %137 : vector<1x128xf32>
    %c31 = arith.constant 31 : index
    %139 = memref.load %arg1[%c31] : memref<41xf32, #tpu.memory_space<smem>>
    %140 = vector.broadcast %139 : f32 to vector<1x128xf32>
    %141 = arith.mulf %67, %140 : vector<1x128xf32>
    %142 = arith.addf %138, %141 : vector<1x128xf32>
    %c35 = arith.constant 35 : index
    %143 = memref.load %arg1[%c35] : memref<41xf32, #tpu.memory_space<smem>>
    %144 = vector.broadcast %143 : f32 to vector<1x128xf32>
    %145 = arith.addf %142, %144 : vector<1x128xf32>
    %cst_8 = arith.constant 0.000000e+00 : f32
    %146 = vector.broadcast %cst_8 : f32 to vector<1x128xf32>
    %147 = arith.maximumf %145, %146 : vector<1x128xf32>
    %c36 = arith.constant 36 : index
    %148 = memref.load %arg1[%c36] : memref<41xf32, #tpu.memory_space<smem>>
    %149 = vector.broadcast %148 : f32 to vector<1x128xf32>
    %150 = arith.mulf %87, %149 : vector<1x128xf32>
    %c37 = arith.constant 37 : index
    %151 = memref.load %arg1[%c37] : memref<41xf32, #tpu.memory_space<smem>>
    %152 = vector.broadcast %151 : f32 to vector<1x128xf32>
    %153 = arith.mulf %107, %152 : vector<1x128xf32>
    %154 = arith.addf %150, %153 : vector<1x128xf32>
    %c38 = arith.constant 38 : index
    %155 = memref.load %arg1[%c38] : memref<41xf32, #tpu.memory_space<smem>>
    %156 = vector.broadcast %155 : f32 to vector<1x128xf32>
    %157 = arith.mulf %127, %156 : vector<1x128xf32>
    %158 = arith.addf %154, %157 : vector<1x128xf32>
    %c39 = arith.constant 39 : index
    %159 = memref.load %arg1[%c39] : memref<41xf32, #tpu.memory_space<smem>>
    %160 = vector.broadcast %159 : f32 to vector<1x128xf32>
    %161 = arith.mulf %147, %160 : vector<1x128xf32>
    %162 = arith.addf %158, %161 : vector<1x128xf32>
    %c40 = arith.constant 40 : index
    %163 = memref.load %arg1[%c40] : memref<41xf32, #tpu.memory_space<smem>>
    %164 = vector.broadcast %163 : f32 to vector<1x128xf32>
    %165 = arith.addf %162, %164 : vector<1x128xf32>
    %c0_9 = arith.constant 0 : index
    %c0_10 = arith.constant 0 : index
    %166 = vector.load %arg3[%c0_9, %c0_10] : memref<1x128xf32, #tpu.memory_space<vmem>>, vector<1x128xf32>
    tpu.vector_store %arg3[%c0_9, %c0_10], %165 {strides = array<i32>} : memref<1x128xf32, #tpu.memory_space<vmem>>, vector<1x128xf32>,
    return
  }
  func.func @transform_0(%arg0: i32) -> i32 {
    %c0_i32 = arith.constant 0 : i32
    %c0_i32_0 = arith.constant 0 : i32
    return %c0_i32 : i32
  }
  func.func @transform_1(%arg0: i32) -> (i32, i32) {
    %c0_i32 = arith.constant 0 : i32
    %c0_i32_0 = arith.constant 0 : i32
    return %c0_i32, %arg0 : i32, i32
  }
  func.func @transform_2(%arg0: i32) -> (i32, i32) {
    %c0_i32 = arith.constant 0 : i32
    %c0_i32_0 = arith.constant 0 : i32
    return %c0_i32, %arg0 : i32, i32
  }
}

</mosaic_0001>

<bundles_post_ra>
// kernel: mlp_forward.1
= control target key start
LH: loop header
LB: loop body
LE: loop exit
PB: predicated region body
PF: predicated region fallthrough
CT: control target
= control target key end

     0   :  { %7 = vsyncpa [#allocation3], 0  ;;  %s388_s0 = inlined_call_operand.vmem [shape: f32[41], index: 0, kind: input, shape index: {}]   ;;  %s389_s1 = inlined_call_operand.vmem [shape: f32[3,128], index: 1, kind: input, shape index: {}]   ;;  %s390_s2 = inlined_call_operand.vmem [shape: f32[1,128], index: 2, kind: output, shape index: {}]  }
   0x1   :  { %s14_s11 = sshll.u32 %s388_s0, 4  ;;  %s15_s11 = int_to_ptr.vmem [resolvable:$true] %s14_s11 }
   0x2   :  { %s250_s12 = scalar_lea.vmem %s15_s11, 16  ;;  %p255_p1 = scmp.lt.s32.totalorder %s15_s11, %s15_s11 }
   0x3   :  { %p251_p0 = scmp.ne.s32.totalorder %s15_s11, %s250_s12  ;;  %p256_p2 = scmp.lt.s32.totalorder %s250_s12, %s250_s12 }
   0x5   :  { %p257_p3 = por %p256_p2, %p255_p1 }
   0x7   :  { %p258_p4 = pnand %p257_p3, %p251_p0 }
   0x9   :  { %261 = shalt.err (!%p258_p4)
}
   0xa   :  { %s264_s13 = smov [#allocation2]  }
   0xb   :  { %17 = dma.vmem_to_smem %s15_s11, 16, %s264_s13, [#allocation3]  }
   0xc   :  { %262 = dma.done.wait [#allocation3], 16  }
   0xd   :  { %263 = vsyncadd [#allocation3], 4294967280 }
   0xe   :  { %23 = sfence }
   0xf   :  { %s25_s14 = sld [smem:[#allocation2]]  ;;  %s209_s15 = sld [smem:[#allocation2 + $0x4]]  ;;  %v24_v0 = vld [vmem:[%s389_s1] sm:$0x7] }
  0x10   :  { %s210_s16 = sld [smem:[#allocation2 + $0x8]]  ;;  %s283_s17 = sld [smem:[#allocation2 + $0xc]] }
  0x11   :  { %s212_s18 = sld [smem:[#allocation2 + $0x1]]  ;;  %s213_s0 = sld [smem:[#allocation2 + $0x5]] }
  0x12   :  { %s214_s19 = sld [smem:[#allocation2 + $0x9]]  ;;  %s285_s20 = sld [smem:[#allocation2 + $0xd]] }
  0x13   :  { %s290_s23 = sld [smem:[#allocation2 + $0x2]]  ;;  %s292_s24 = sld [smem:[#allocation2 + $0x6]] }
  0x14   :  { %s294_s25 = sld [smem:[#allocation2 + $0xa]]  ;;  %s296_s26 = sld [smem:[#allocation2 + $0x3]] }
  0x15   :  { %v26_v1 = vstv %s25_s14  ;;  %v29_v2 = vstv %s209_s15  ;;  %s298_s27 = sld [smem:[#allocation2 + $0x7]]  ;;  %s300_s28 = sld [smem:[#allocation2 + $0xb]] }
  0x16   :  { %v27_v3 = vmul.f32 %v26_v1, %v24_v0  ;;  %v30_v4 = vmul.f32 %v29_v2, %v24_v0  ;;  %v36_v5 = vstv %s210_s16  ;;  %s302_s1 = sld [smem:[#allocation2 + $0xe]]  ;;  %s304_s29 = sld [smem:[#allocation2 + $0x10]]  ;;  %v43_v14 = vstv %s283_s17 }
  0x17   :  { %v37_v6 = vmul.f32 %v36_v5, %v24_v0  ;;  %v47_v7 = vstv %s212_s18  ;;  %v50_v8 = vstv %s213_s0  ;;  %s306_s30 = sld [smem:[#allocation2 + $0xf]]  ;;  %s310_s3 = sld [smem:[#allocation2 + $0x14]] }
  0x18   :  { %v32_v9 = vrot.slane %v30_v4, 1  ;;  %v48_v10 = vmul.f32 %v47_v7, %v24_v0  ;;  %v51_v11 = vmul.f32 %v50_v8, %v24_v0  ;;  %v57_v12 = vstv %s214_s19  ;;  %s312_s4 = sld [smem:[#allocation2 + $0x18]]  ;;  %s316_s5 = sld [smem:[#allocation2 + $0x1c]] }
  0x19   :  { %v39_v13 = vrot.slane %v37_v6, 2  ;;  %v58_v15 = vmul.f32 %v57_v12, %v24_v0  ;;  %v68_v16 = vstv %s290_s23  ;;  %v64_v19 = vstv %s285_s20  ;;  %s318_s6 = sld [smem:[#allocation2 + $0x11]]  ;;  %s321_s7 = sld [smem:[#allocation2 + $0x15]] }
  0x1a   :  { %v34_v17 = vadd.f32 %v32_v9, %v27_v3  ;;  %v53_v18 = vrot.slane %v51_v11, 1  ;;  %v71_v20 = vstv %s292_s24  ;;  %v69_v22 = vmul.f32 %v68_v16, %v24_v0  ;;  %s323_s8 = sld [smem:[#allocation2 + $0x19]]  ;;  %s326_s9 = sld [smem:[#allocation2 + $0x20]] }
  0x1b   :  { %v60_v21 = vrot.slane %v58_v15, 2  ;;  %v72_v23 = vmul.f32 %v71_v20, %v24_v0  ;;  %v78_v24 = vstv %s294_s25  ;;  %v89_v28 = vstv %s296_s26  ;;  %s330_s10 = sld [smem:[#allocation2 + $0x1d]]  ;;  %s332_s11 = sld [smem:[#allocation2 + $0x12]] }
  0x1c   :  { %v41_v25 = vadd.f32 %v39_v13, %v34_v17  ;;  %v55_v26 = vadd.f32 %v53_v18, %v48_v10  ;;  %v79_v27 = vmul.f32 %v78_v24, %v24_v0  ;;  %v90_v30 = vmul.f32 %v89_v28, %v24_v0  ;;  %s336_s12 = sld [smem:[#allocation2 + $0x16]]  ;;  %s338_s13 = sld [smem:[#allocation2 + $0x1a]] }
  0x1d   :  { %v74_v29 = vrot.slane %v72_v23, 1  ;;  %v92_v31 = vstv %s298_s27  ;;  %v99_v32 = vstv %s300_s28  ;;  %v85_v38 = vstv %s302_s1  ;;  %s341_s14 = sld [smem:[#allocation2 + $0x1e]]  ;;  %s345_s15 = sld [smem:[#allocation2 + $0x21]] }
  0x1e   :  { %v44_v33 = vadd.f32 %v43_v14, %v41_v25  ;;  %v62_v34 = vadd.f32 %v60_v21, %v55_v26  ;;  %v81_v35 = vrot.slane %v79_v27, 2  ;;  %v93_v36 = vmul.f32 %v92_v31, %v24_v0  ;;  %s347_s16 = sld [smem:[#allocation2 + $0x13]]  ;;  %s350_s17 = sld [smem:[#allocation2 + $0x17]] }
  0x1f   :  { %v76_v37 = vadd.f32 %v74_v29, %v69_v22  ;;  %v100_v39 = vmul.f32 %v99_v32, %v24_v0  ;;  %v110_v40 = vstv %s304_s29  ;;  %v106_v44 = vstv %s306_s30  ;;  %s355_s18 = sld [smem:[#allocation2 + $0x1b]]  ;;  %s357_s0 = sld [smem:[#allocation2 + $0x1f]] }
  0x20   :  { %v45_v41 = vmax.f32 %v44_v33, 0.0  ;;  %v65_v42 = vadd.f32 %v64_v19, %v62_v34  ;;  %v95_v43 = vrot.slane %v93_v36, 1  ;;  %v113_v47 = vstv %s310_s3  ;;  %s362_s19 = sld [smem:[#allocation2 + $0x22]]  ;;  %s366_s20 = sld [smem:[#allocation2 + $0x24]] }
  0x21   :  { %v83_v45 = vadd.f32 %v81_v35, %v76_v37  ;;  %v102_v46 = vrot.slane %v100_v39, 2  ;;  %v117_v48 = vstv %s312_s4  ;;  %v121_v52 = vstv %s316_s5  ;;  %s368_s21 = sld [smem:[#allocation2 + $0x25]]  ;;  %s373_s22 = sld [smem:[#allocation2 + $0x23]] }
  0x22   :  { %v66_v49 = vmax.f32 %v65_v42, 0.0  ;;  %v97_v50 = vadd.f32 %v95_v43, %v90_v30  ;;  %v111_v51 = vmul.f32 %v110_v40, %v45_v41  ;;  %v129_v54 = vstv %s318_s6  ;;  %s375_s23 = sld [smem:[#allocation2 + $0x26]]  ;;  %s247_s24 = sld [smem:[#allocation2 + $0x27]] }
  0x23   :  { %v86_v53 = vadd.f32 %v85_v38, %v83_v45  ;;  %v132_v55 = vstv %s321_s7  ;;  %v136_v56 = vstv %s323_s8  ;;  %v130_v59 = vmul.f32 %v129_v54, %v45_v41  ;;  %s248_s25 = sld [smem:[#allocation2 + $0x28]] }
  0x24   :  { %v104_v57 = vadd.f32 %v102_v46, %v97_v50  ;;  %v114_v58 = vmul.f32 %v113_v47, %v66_v49  ;;  %v133_v60 = vmul.f32 %v132_v55, %v66_v49  ;;  %v125_v62 = vstv %s326_s9 }
  0x25   :  { %v87_v61 = vmax.f32 %v86_v53, 0.0  ;;  %v140_v63 = vstv %s330_s10  ;;  %v148_v0 = vstv %s332_s11  ;;  %v151_v7 = vstv %s336_s12 }
  0x26   :  { %v107_v1 = vadd.f32 %v106_v44, %v104_v57  ;;  %v115_v2 = vadd.f32 %v114_v58, %v111_v51  ;;  %v134_v3 = vadd.f32 %v133_v60, %v130_v59  ;;  %v149_v4 = vmul.f32 %v148_v0, %v45_v41 }
  0x27   :  { %v118_v5 = vmul.f32 %v117_v48, %v87_v61  ;;  %v137_v6 = vmul.f32 %v136_v56, %v87_v61  ;;  %v155_v8 = vstv %s338_s13  ;;  %v152_v10 = vmul.f32 %v151_v7, %v66_v49 }
  0x28   :  { %v108_v9 = vmax.f32 %v107_v1, 0.0  ;;  %v156_v11 = vmul.f32 %v155_v8, %v87_v61  ;;  %v159_v12 = vstv %s341_s14  ;;  %v144_v15 = vstv %s345_s15 }
  0x29   :  { %v119_v13 = vadd.f32 %v118_v5, %v115_v2  ;;  %v138_v14 = vadd.f32 %v137_v6, %v134_v3  ;;  %v167_v16 = vstv %s347_s16  ;;  %v153_v19 = vadd.f32 %v152_v10, %v149_v4 }
  0x2a   :  { %v122_v17 = vmul.f32 %v121_v52, %v108_v9  ;;  %v141_v18 = vmul.f32 %v140_v63, %v108_v9  ;;  %v160_v20 = vmul.f32 %v159_v12, %v108_v9  ;;  %v168_v21 = vmul.f32 %v167_v16, %v45_v41 }
  0x2b   :  { %v170_v22 = vstv %s350_s17  ;;  %v174_v23 = vstv %s355_s18  ;;  %v178_v24 = vstv %s357_s0  ;;  %v157_v27 = vadd.f32 %v156_v11, %v153_v19 }
  0x2c   :  { %v123_v25 = vadd.f32 %v122_v17, %v119_v13  ;;  %v142_v26 = vadd.f32 %v141_v18, %v138_v14  ;;  %v171_v28 = vmul.f32 %v170_v22, %v66_v49  ;;  %v163_v29 = vstv %s362_s19 }
  0x2d   :  { %v175_v30 = vmul.f32 %v174_v23, %v87_v61  ;;  %v179_v31 = vmul.f32 %v178_v24, %v108_v9  ;;  %v161_v34 = vadd.f32 %v160_v20, %v157_v27  ;;  %v186_v36 = vstv %s366_s20 }
  0x2e   :  { %v126_v32 = vadd.f32 %v125_v62, %v123_v25  ;;  %v145_v33 = vadd.f32 %v144_v15, %v142_v26  ;;  %v172_v35 = vadd.f32 %v171_v28, %v168_v21  ;;  %v189_v37 = vstv %s368_s21 }
  0x2f   :  { %v164_v40 = vadd.f32 %v163_v29, %v161_v34  ;;  %v182_v42 = vstv %s373_s22  ;;  %v193_v43 = vstv %s375_s23  ;;  %v197_v51 = vstv %s247_s24 }
  0x30   :  { %v127_v38 = vmax.f32 %v126_v32, 0.0  ;;  %v146_v39 = vmax.f32 %v145_v33, 0.0  ;;  %v176_v41 = vadd.f32 %v175_v30, %v172_v35  ;;  %v201_v55 = vstv %s248_s25 }
  0x31   :  { %v165_v44 = vmax.f32 %v164_v40, 0.0 }
  0x32   :  { %v180_v45 = vadd.f32 %v179_v31, %v176_v41  ;;  %v187_v46 = vmul.f32 %v186_v36, %v127_v38  ;;  %v190_v47 = vmul.f32 %v189_v37, %v146_v39 }
  0x33   :  { %v194_v50 = vmul.f32 %v193_v43, %v165_v44 }
  0x34   :  { %v183_v48 = vadd.f32 %v182_v42, %v180_v45  ;;  %v191_v49 = vadd.f32 %v190_v47, %v187_v46 }
  0x36   :  { %v184_v52 = vmax.f32 %v183_v48, 0.0  ;;  %v195_v53 = vadd.f32 %v194_v50, %v191_v49 }
  0x38   :  { %v198_v54 = vmul.f32 %v197_v51, %v184_v52 }
  0x3a   :  { %v199_v56 = vadd.f32 %v198_v54, %v195_v53 }
  0x3c   :  { %v202_v57 = vadd.f32 %v201_v55, %v199_v56 }
  0x3e   :  { %203 = vst [vmem:[%s390_s2] sm:$0x1] %v202_v57 }
  0x3f   :  { %208 = vsyncpa [#allocation3], 1 }

</bundles_post_ra>
